<compile_context>
chip_gen: v7x
topology: tpu7x:2x2x1
jax: 0.10.0
libtpu: 0.0.40
codegen_flags: <defaults>
</compile_context>

<pallas_src>
import jax
import jax.numpy as jnp
from jax.experimental import pallas as pl
from jax.experimental.pallas import tpu as pltpu

HIDDEN = 128  # hidden_layer in the PyTorch script


def input_gate_kernel(z_ref, h_ref, wz_ref, wh_ref, b_ref, out_ref):
    # Two fused (tb, H) x (H, 2H) MXU matmuls cover all four gate linears.
    cdt = wz_ref.dtype  # bf16 weights -> cast activations to match (cheap VPU op)
    z = z_ref[...].astype(cdt)
    h = h_ref[...].astype(cdt)

    s = (jnp.dot(z, wz_ref[...], preferred_element_type=jnp.float32)
         + jnp.dot(h, wh_ref[...], preferred_element_type=jnp.float32)
         + b_ref[...])                      # (tb, 2H), f32

    H = out_ref.shape[-1]
    it1 = jax.nn.sigmoid(s[:, :H])          # gate 1 (sigmoid half)  -> EUP
    it2 = jnp.tanh(s[:, H:])                # gate 2 (tanh half)     -> EUP
    out_ref[...] = (it1 * it2).astype(out_ref.dtype)


def prepare_params(params, *, weight_dtype=jnp.bfloat16):
    """One-time parameter prep (transpose/concat/cast), hoisted out of the
    per-timestep call path.

    params: dict with w1..w4 of shape (H, H) in PyTorch (out, in) layout and
    b1..b4 of shape (H,). Returns fused, pre-transposed, bf16-cast tensors.
    """
    w1, w2, w3, w4 = (params[f"w{i}"] for i in range(1, 5))
    b1, b2, b3, b4 = (params[f"b{i}"] for i in range(1, 5))
    H = w1.shape[0]
    wz = jnp.concatenate([w1.T, w3.T], axis=1).astype(weight_dtype)   # (H, 2H)
    wh = jnp.concatenate([w2.T, w4.T], axis=1).astype(weight_dtype)   # (H, 2H)
    b = jnp.concatenate([b1 + b2, b3 + b4]).reshape(1, 2 * H).astype(jnp.float32)
    return {"wz": wz, "wh": wh, "b": b}


def input_gate(h_tminus1, z_t, prepared, *, tb=None):
    """prepared: output of prepare_params()."""
    B, H = h_tminus1.shape
    assert z_t.shape == (B, H)
    wz, wh, b = prepared["wz"], prepared["wh"], prepared["b"]
    assert wz.shape == (H, 2 * H) and wh.shape == (H, 2 * H) and b.shape == (1, 2 * H)

    if tb is None:
        # Small B: single block (no per-step overhead). Large B: 128-row tiles.
        tb = B if B <= 128 else 128
    grid = (pl.cdiv(B, tb),)

    x_spec = pl.BlockSpec((tb, H), lambda i: (i, 0))
    # Grid-invariant weight / bias blocks (tiny: 64 KiB each in bf16).
    w_spec = pl.BlockSpec((H, 2 * H), lambda i: (0, 0))
    b_spec = pl.BlockSpec((1, 2 * H), lambda i: (0, 0))

    return pl.pallas_call(
        input_gate_kernel,
        out_shape=jax.ShapeDtypeStruct((B, H), h_tminus1.dtype),
        grid_spec=pltpu.PrefetchScalarGridSpec(
            num_scalar_prefetch=0,
            grid=grid,
            in_specs=[x_spec, x_spec, w_spec, w_spec, b_spec],
            out_specs=x_spec,
        ),
        compiler_params=pltpu.CompilerParams(
            dimension_semantics=("parallel",),
            vmem_limit_bytes=32 * 1024 * 1024,
        ),
    )(z_t, h_tminus1, wz, wh, b)


def _reference(h, z, params):
    def lin(x, w, b):
        return x @ w.T + b
    s1 = lin(z, params["w1"], params["b1"]) + lin(h, params["w2"], params["b2"])
    s2 = lin(z, params["w3"], params["b3"]) + lin(h, params["w4"], params["b4"])
    return jax.nn.sigmoid(s1) * jnp.tanh(s2)


if __name__ == "__main__":
    key = jax.random.PRNGKey(0)
    B, H = 16, HIDDEN

    keys = jax.random.split(key, 10)
    h_tminus1 = jax.random.normal(keys[0], (B, H), dtype=jnp.float32)
    z_t = jax.random.normal(keys[1], (B, H), dtype=jnp.float32)

    # Deterministic parameter init, PyTorch-Linear-style U(-1/sqrt(H), 1/sqrt(H)).
    bound = 1.0 / (H ** 0.5)
    params = {}
    for i in range(1, 5):
        params[f"w{i}"] = jax.random.uniform(
            keys[2 * i], (H, H), minval=-bound, maxval=bound, dtype=jnp.float32)
        params[f"b{i}"] = jax.random.uniform(
            keys[2 * i + 1], (H,), minval=-bound, maxval=bound, dtype=jnp.float32)

    prepared = prepare_params(params)          # one-time prep (hoisted)
    out = input_gate(h_tminus1, z_t, prepared)
    out = jax.block_until_ready(out)

    ref = _reference(h_tminus1, z_t, params)   # f32 reference
    assert out.shape == (B, H)
    # bf16 weights (f32 accumulation) => small drift vs the pure-f32 reference.
    max_err = float(jnp.max(jnp.abs(out.astype(jnp.float32) - ref)))
    assert max_err < 3e-2, f"mismatch vs reference: max abs err {max_err}"

    print("KERNEL_OK")
</pallas_src>

<mosaic_0001>
module attributes {stable_mosaic.version = 11 : i64} {
  func.func @input_gate_kernel(%arg0: i32, %arg1: memref<16x128xf32, #tpu.memory_space<vmem>>, %arg2: memref<16x128xf32, #tpu.memory_space<vmem>>, %arg3: memref<128x256xbf16, #tpu.memory_space<vmem>>, %arg4: memref<128x256xbf16, #tpu.memory_space<vmem>>, %arg5: memref<1x256xf32, #tpu.memory_space<vmem>>, %arg6: memref<16x128xf32, #tpu.memory_space<vmem>>) attributes {dimension_semantics = [#tpu.dimension_semantics<parallel>], iteration_bounds = array<i64: 1>, scalar_prefetch = 0 : i64, scratch_operands = 0 : i64, tpu.core_type = #tpu.core_type<tc>, window_params = [{transform_indices = @transform_0, window_bounds = array<i64: 16, 128>}, {transform_indices = @transform_1, window_bounds = array<i64: 16, 128>}, {pipeline_mode = #tpu.pipeline_mode<synchronous>, transform_indices = @transform_2, window_bounds = array<i64: 128, 256>}, {pipeline_mode = #tpu.pipeline_mode<synchronous>, transform_indices = @transform_3, window_bounds = array<i64: 128, 256>}, {pipeline_mode = #tpu.pipeline_mode<synchronous>, transform_indices = @transform_4, window_bounds = array<i64: 1, 256>}, {transform_indices = @transform_5, window_bounds = array<i64: 16, 128>}]} {
    %c0 = arith.constant 0 : index
    %c0_0 = arith.constant 0 : index
    %0 = vector.load %arg1[%c0, %c0_0] : memref<16x128xf32, #tpu.memory_space<vmem>>, vector<16x128xf32>
    %1 = arith.truncf %0 : vector<16x128xf32> to vector<16x128xbf16>
    %c0_1 = arith.constant 0 : index
    %c0_2 = arith.constant 0 : index
    %2 = vector.load %arg2[%c0_1, %c0_2] : memref<16x128xf32, #tpu.memory_space<vmem>>, vector<16x128xf32>
    %3 = arith.truncf %2 : vector<16x128xf32> to vector<16x128xbf16>
    %c0_3 = arith.constant 0 : index
    %c0_4 = arith.constant 0 : index
    %4 = vector.load %arg3[%c0_3, %c0_4] : memref<128x256xbf16, #tpu.memory_space<vmem>>, vector<128x256xbf16>
    %cst = arith.constant dense<0.000000e+00> : vector<16x256xf32>
    %5 = tpu.matmul %1, %4, %cst {dimension_numbers = #tpu.dot_dimension_numbers<[1], [0], [0], [1], [0, 0, 1, 1], [], []>} : vector<16x128xbf16>, vector<128x256xbf16>, vector<16x256xf32> -> vector<16x256xf32>
    %c0_5 = arith.constant 0 : index
    %c0_6 = arith.constant 0 : index
    %6 = vector.load %arg4[%c0_5, %c0_6] : memref<128x256xbf16, #tpu.memory_space<vmem>>, vector<128x256xbf16>
    %cst_7 = arith.constant dense<0.000000e+00> : vector<16x256xf32>
    %7 = tpu.matmul %3, %6, %cst_7 {dimension_numbers = #tpu.dot_dimension_numbers<[1], [0], [0], [1], [0, 0, 1, 1], [], []>} : vector<16x128xbf16>, vector<128x256xbf16>, vector<16x256xf32> -> vector<16x256xf32>
    %8 = arith.addf %5, %7 : vector<16x256xf32>
    %c0_8 = arith.constant 0 : index
    %c0_9 = arith.constant 0 : index
    %9 = vector.load %arg5[%c0_8, %c0_9] : memref<1x256xf32, #tpu.memory_space<vmem>>, vector<1x256xf32>
    %10 = vector.broadcast %9 : vector<1x256xf32> to vector<16x256xf32>
    %11 = arith.addf %8, %10 : vector<16x256xf32>
    %12 = vector.extract_strided_slice %11 {offsets = [0, 0], sizes = [16, 128], strides = [1, 1]} : vector<16x256xf32> to vector<16x128xf32>
    %13 = arith.negf %12 : vector<16x128xf32>
    %14 = math.exp %13 : vector<16x128xf32>
    %cst_10 = arith.constant 1.000000e+00 : f32
    %15 = vector.broadcast %cst_10 : f32 to vector<16x128xf32>
    %16 = arith.addf %15, %14 : vector<16x128xf32>
    %17 = arith.divf %15, %16 : vector<16x128xf32>
    %18 = vector.extract_strided_slice %11 {offsets = [0, 128], sizes = [16, 128], strides = [1, 1]} : vector<16x256xf32> to vector<16x128xf32>
    %19 = math.tanh %18 : vector<16x128xf32>
    %20 = arith.mulf %17, %19 : vector<16x128xf32>
    %c0_11 = arith.constant 0 : index
    %c0_12 = arith.constant 0 : index
    %21 = vector.load %arg6[%c0_11, %c0_12] : memref<16x128xf32, #tpu.memory_space<vmem>>, vector<16x128xf32>
    tpu.vector_store %arg6[%c0_11, %c0_12], %20 {strides = array<i32>} : memref<16x128xf32, #tpu.memory_space<vmem>>, vector<16x128xf32>,
    return
  }
  func.func @transform_0(%arg0: i32) -> (i32, i32) {
    %c0_i32 = arith.constant 0 : i32
    %c0_i32_0 = arith.constant 0 : i32
    return %arg0, %c0_i32 : i32, i32
  }
  func.func @transform_1(%arg0: i32) -> (i32, i32) {
    %c0_i32 = arith.constant 0 : i32
    %c0_i32_0 = arith.constant 0 : i32
    return %arg0, %c0_i32 : i32, i32
  }
  func.func @transform_2(%arg0: i32) -> (i32, i32) {
    %c0_i32 = arith.constant 0 : i32
    %c0_i32_0 = arith.constant 0 : i32
    %c0_i32_1 = arith.constant 0 : i32
    return %c0_i32, %c0_i32_0 : i32, i32
  }
  func.func @transform_3(%arg0: i32) -> (i32, i32) {
    %c0_i32 = arith.constant 0 : i32
    %c0_i32_0 = arith.constant 0 : i32
    %c0_i32_1 = arith.constant 0 : i32
    return %c0_i32, %c0_i32_0 : i32, i32
  }
  func.func @transform_4(%arg0: i32) -> (i32, i32) {
    %c0_i32 = arith.constant 0 : i32
    %c0_i32_0 = arith.constant 0 : i32
    %c0_i32_1 = arith.constant 0 : i32
    return %c0_i32, %c0_i32_0 : i32, i32
  }
  func.func @transform_5(%arg0: i32) -> (i32, i32) {
    %c0_i32 = arith.constant 0 : i32
    %c0_i32_0 = arith.constant 0 : i32
    return %arg0, %c0_i32 : i32, i32
  }
}

</mosaic_0001>

<bundles_post_ra>
// kernel: tpu_custom_call.1
= control target key start
LH: loop header
LB: loop body
LE: loop exit
PB: predicated region body
PF: predicated region fallthrough
CT: control target
= control target key end

     0   :  { %10 = vsyncpa [#allocation3], 0  ;;  %s768_s0 = inlined_call_operand.hbm [shape: f32[16,128], index: 0, kind: input, shape index: {}]   ;;  %s769_s1 = inlined_call_operand.hbm [shape: f32[16,128], index: 1, kind: input, shape index: {}]   ;;  %s770_s2 = inlined_call_operand.hbm [shape: bf16[128,256], index: 2, kind: input, shape index: {}]   ;;  %s771_s3 = inlined_call_operand.hbm [shape: bf16[128,256], index: 3, kind: input, shape index: {}]   ;;  %s772_s4 = inlined_call_operand.vmem [shape: f32[1,256], index: 4, kind: input, shape index: {}]   ;;  %s773_s5 = inlined_call_operand.hbm [shape: f32[16,128], index: 5, kind: output, shape index: {}]  }
   0x1   :  { %11 = vsyncpa [#allocation6], 0 }
   0x2   :  { %12 = vsyncpa [#allocation9], 0 }
   0x3   :  { %13 = vsyncpa [#allocation4], 0  ;;  %s638_s18 = smov [#allocation5]   ;;  %s639_s20 = smov [#allocation2]  }
   0x4   :  { %s31_s19 = sshll.u32 %s638_s18, 4  ;;  %s19_s21 = sshll.u32 %s639_s20, 4  ;;  %s32_s19 = int_to_ptr.vmem [resolvable:$true] %s31_s19  ;;  %s676_s21 = int_to_ptr.vmem [resolvable:$true] %s19_s21 }
   0x5   :  { %s520_s24 = scalar_lea.hbm %s769_s1, 256 }
   0x6   :  { %p521_p0 = scmp.ne.s32.totalorder %s769_s1, %s520_s24  ;;  %p524_p1 = scmp.lt.u32.totalorder %s520_s24, %s769_s1 }
   0x8   :  { %p526_p2 = pnand %p524_p1, %p521_p0 }
   0xa   :  { %529 = shalt.err (!%p526_p2)
}
   0xb   :  { %s530_s29 = scalar_lea.vmem %s32_s19, 256  ;;  %p535_p4 = scmp.lt.s32.totalorder %s32_s19, %s32_s19 }
   0xc   :  { %p531_p3 = scmp.ne.s32.totalorder %s32_s19, %s530_s29  ;;  %p536_p5 = scmp.lt.s32.totalorder %s530_s29, %s530_s29 }
   0xe   :  { %p537_p6 = por %p536_p5, %p535_p4 }
  0x10   :  { %p538_p7 = pnand %p537_p6, %p531_p3 }
  0x12   :  { %541 = shalt.err (!%p538_p7)
}
  0x13   :  { %s640_s30 = smov 128   ;;  %s641_s6 = smov 8  }
  0x14   :  { %37 = dma.hbm_to_vmem [thread:$0]  %s769_s1, 256, %s32_s19, [#allocation6], %s640_s30, %s640_s30, %s641_s6  }
  0x15   :  { %s542_s11 = scalar_lea.hbm %s768_s0, 256 }
  0x16   :  { %p543_p8 = scmp.ne.s32.totalorder %s768_s0, %s542_s11  ;;  %p546_p9 = scmp.lt.u32.totalorder %s542_s11, %s768_s0 }
  0x18   :  { %p548_p10 = pnand %p546_p9, %p543_p8 }
  0x1a   :  { %551 = shalt.err (!%p548_p10)
}
  0x1b   :  { %s552_s16 = scalar_lea.vmem %s676_s21, 256  ;;  %p557_p12 = scmp.lt.s32.totalorder %s676_s21, %s676_s21 }
  0x1c   :  { %p553_p11 = scmp.ne.s32.totalorder %s676_s21, %s552_s16  ;;  %p558_p13 = scmp.lt.s32.totalorder %s552_s16, %s552_s16 }
  0x1e   :  { %p559_p0 = por %p558_p13, %p557_p12 }
  0x20   :  { %p560_p1 = pnand %p559_p0, %p553_p11 }
  0x22   :  { %563 = shalt.err (!%p560_p1)
}
  0x23   :  { %25 = dma.hbm_to_vmem [thread:$0]  %s768_s0, 256, %s676_s21, [#allocation3], %s640_s30, %s640_s30, %s641_s6  }
  0x24   :  { %s642_s18 = smov [#allocation7]   ;;  %s643_s20 = smov [#allocation8]  }
  0x25   :  { %s43_s19 = sshll.u32 %s642_s18, 4  ;;  %s55_s22 = sshll.u32 %s643_s20, 4  ;;  %s44_s19 = int_to_ptr.vmem [resolvable:$true] %s43_s19  ;;  %s713_s22 = int_to_ptr.vmem [resolvable:$true] %s55_s22 }
  0x26   :  { %s564_s25 = scalar_lea.hbm %s770_s2, 2048 }
  0x27   :  { %p565_p2 = scmp.ne.s32.totalorder %s770_s2, %s564_s25  ;;  %p568_p3 = scmp.lt.u32.totalorder %s564_s25, %s770_s2 }
  0x29   :  { %p570_p4 = pnand %p568_p3, %p565_p2 }
  0x2b   :  { %573 = shalt.err (!%p570_p4)
}
  0x2c   :  { %s574_s0 = scalar_lea.vmem %s44_s19, 2048  ;;  %p579_p6 = scmp.lt.s32.totalorder %s44_s19, %s44_s19 }
  0x2d   :  { %p575_p5 = scmp.ne.s32.totalorder %s44_s19, %s574_s0  ;;  %p580_p7 = scmp.lt.s32.totalorder %s574_s0, %s574_s0 }
  0x2f   :  { %p581_p8 = por %p580_p7, %p579_p6 }
  0x31   :  { %p582_p9 = pnand %p581_p8, %p575_p5 }
  0x33   :  { %585 = shalt.err (!%p582_p9)
}
  0x34   :  { %49 = dma.hbm_to_vmem [thread:$0]  %s770_s2, 2048, %s44_s19, [#allocation6], %s640_s30, %s640_s30, %s641_s6  }
  0x35   :  { %s586_s10 = scalar_lea.hbm %s771_s3, 2048 }
  0x36   :  { %p587_p10 = scmp.ne.s32.totalorder %s771_s3, %s586_s10  ;;  %p590_p11 = scmp.lt.u32.totalorder %s586_s10, %s771_s3 }
  0x38   :  { %p592_p12 = pnand %p590_p11, %p587_p10 }
  0x3a   :  { %595 = shalt.err (!%p592_p12)
}
  0x3b   :  { %s596_s15 = scalar_lea.vmem %s713_s22, 2048  ;;  %p601_p0 = scmp.lt.s32.totalorder %s713_s22, %s713_s22 }
  0x3c   :  { %p597_p13 = scmp.ne.s32.totalorder %s713_s22, %s596_s15  ;;  %p602_p1 = scmp.lt.s32.totalorder %s596_s15, %s596_s15 }
  0x3e   :  { %p603_p2 = por %p602_p1, %p601_p0 }
  0x40   :  { %p604_p3 = pnand %p603_p2, %p597_p13 }
  0x42   :  { %607 = shalt.err (!%p604_p3)
}
  0x43   :  { %61 = dma.hbm_to_vmem [thread:$0]  %s771_s3, 2048, %s713_s22, [#allocation9], %s640_s30, %s640_s30, %s641_s6  }
  0x44   :  { %630 = dma.done.wait [#allocation3], 256  }
  0x45   :  { %631 = vsyncadd [#allocation3], 4294967040 }
  0x46   :  { %632 = dma.done.wait [#allocation6], 2304  }
  0x47   :  { %633 = vsyncadd [#allocation6], 4294964992 }
  0x48   :  { %634 = dma.done.wait [#allocation9], 2048  }
  0x49   :  { %635 = vsyncadd [#allocation9], 4294965248  ;;  %v644_v0 = vmov 0   ;;  %v460_v1 = vld [vmem:[#allocation8 + $0x4] ss:$8 sps:$4 sm:$0xff]   ;;  %v80_v33 = vld [vmem:[#allocation5] sm:$0xff]  ;;  %v363_v39 = vlaneseq }
  0x4a   :  { %227 = vmatprep.mubr.bf16.mxu1 %v644_v0  ;;  %350 = vmatprep.mubr.bf16.mxu0 %v644_v0  ;;  %v462_v2 = vld [vmem:[#allocation7 + $0x4] ss:$8 sps:$4 sm:$0xff]   ;;  %v464_v3 = vld [vmem:[#allocation8] ss:$8 sps:$4 sm:$0xff]   ;;  %v466_v5 = vld [vmem:[#allocation8 + $0x14] ss:$8 sps:$4 sm:$0xff]  }
  0x4b   :  { %195 = vmatprep.subr.bf16.mxu1 %v460_v1  ;;  %v465_v4 = vld [vmem:[#allocation7] ss:$8 sps:$4 sm:$0xff]   ;;  %318 = vmatprep.subr.bf16.mxu0 %v462_v2  ;;  %v468_v6 = vld [vmem:[#allocation7 + $0x14] ss:$8 sps:$4 sm:$0xff]   ;;  %v470_v7 = vld [vmem:[#allocation8 + $0x10] ss:$8 sps:$4 sm:$0xff]  }
  0x4c   :  { %196 = vmatpush1.bf16.msra.mxu1 %v464_v3  ;;  %319 = vmatpush1.bf16.msra.mxu0 %v465_v4  ;;  %v471_v8 = vld [vmem:[#allocation7 + $0x10] ss:$8 sps:$4 sm:$0xff]   ;;  %v472_v9 = vld [vmem:[#allocation8 + $0x24] ss:$8 sps:$4 sm:$0xff]   ;;  %v476_v11 = vld [vmem:[#allocation8 + $0x20] ss:$8 sps:$4 sm:$0xff]  }
  0x4d   :  { %197 = vmatprep.subr.bf16.mxu1 %v466_v5  ;;  %320 = vmatprep.subr.bf16.mxu0 %v468_v6  ;;  %v474_v10 = vld [vmem:[#allocation7 + $0x24] ss:$8 sps:$4 sm:$0xff]   ;;  %v477_v12 = vld [vmem:[#allocation7 + $0x20] ss:$8 sps:$4 sm:$0xff]   ;;  %v478_v13 = vld [vmem:[#allocation8 + $0x34] ss:$8 sps:$4 sm:$0xff]  }
  0x4e   :  { %v480_v14 = vld [vmem:[#allocation7 + $0x34] ss:$8 sps:$4 sm:$0xff]   ;;  %v482_v15 = vld [vmem:[#allocation8 + $0x30] ss:$8 sps:$4 sm:$0xff]   ;;  %v484_v17 = vld [vmem:[#allocation8 + $0x44] ss:$8 sps:$4 sm:$0xff]  }
  0x4f   :  { %v483_v16 = vld [vmem:[#allocation7 + $0x30] ss:$8 sps:$4 sm:$0xff]   ;;  %v486_v18 = vld [vmem:[#allocation7 + $0x44] ss:$8 sps:$4 sm:$0xff]   ;;  %v488_v19 = vld [vmem:[#allocation8 + $0x40] ss:$8 sps:$4 sm:$0xff]  }
  0x50   :  { %198 = vmatpush1.bf16.msra.mxu1 %v470_v7  ;;  %321 = vmatpush1.bf16.msra.mxu0 %v471_v8  ;;  %v489_v20 = vld [vmem:[#allocation7 + $0x40] ss:$8 sps:$4 sm:$0xff]   ;;  %v490_v21 = vld [vmem:[#allocation8 + $0x54] ss:$8 sps:$4 sm:$0xff]   ;;  %v494_v23 = vld [vmem:[#allocation8 + $0x50] ss:$8 sps:$4 sm:$0xff]  }
  0x51   :  { %199 = vmatprep.subr.bf16.mxu1 %v472_v9  ;;  %322 = vmatprep.subr.bf16.mxu0 %v474_v10  ;;  %v492_v22 = vld [vmem:[#allocation7 + $0x54] ss:$8 sps:$4 sm:$0xff]   ;;  %v495_v24 = vld [vmem:[#allocation7 + $0x50] ss:$8 sps:$4 sm:$0xff]   ;;  %v496_v25 = vld [vmem:[#allocation8 + $0x64] ss:$8 sps:$4 sm:$0xff]  }
  0x52   :  { %v498_v26 = vld [vmem:[#allocation7 + $0x64] ss:$8 sps:$4 sm:$0xff]   ;;  %v500_v27 = vld [vmem:[#allocation8 + $0x60] ss:$8 sps:$4 sm:$0xff]   ;;  %v502_v29 = vld [vmem:[#allocation8 + $0x74] ss:$8 sps:$4 sm:$0xff]  }
  0x53   :  { %v501_v28 = vld [vmem:[#allocation7 + $0x60] ss:$8 sps:$4 sm:$0xff]   ;;  %v504_v30 = vld [vmem:[#allocation7 + $0x74] ss:$8 sps:$4 sm:$0xff]   ;;  %v506_v31 = vld [vmem:[#allocation8 + $0x70] ss:$8 sps:$4 sm:$0xff]  }
  0x54   :  { %200 = vmatpush1.bf16.msra.mxu1 %v476_v11  ;;  %323 = vmatpush1.bf16.msra.mxu0 %v477_v12  ;;  %v507_v32 = vld [vmem:[#allocation7 + $0x70] ss:$8 sps:$4 sm:$0xff]   ;;  %v77_v35 = vld [vmem:[#allocation2] sm:$0xff]  ;;  %v78_v36 = vld [vmem:[#allocation2 + $0x8] sm:$0xff]  ;;  %v364_v40 = vshrl.u32 %v363_v39, 7 }
  0x55   :  { %201 = vmatprep.subr.bf16.mxu1 %v478_v13  ;;  %324 = vmatprep.subr.bf16.mxu0 %v480_v14  ;;  %v81_v34 = vld [vmem:[#allocation5 + $0x8] sm:$0xff]  ;;  %v79_v38 = vpack.c.bf16 %v78_v36, %v77_v35  ;;  %v361_v42 = vld [vmem:[%s772_s4] sm:$0x3]  ;;  %s645_s4 = smov [#allocation10]  }
  0x56   :  { %v82_v37 = vpack.c.bf16 %v81_v34, %v80_v33  ;;  %v365_v41 = vsub.s32 0, %v364_v40  ;;  %v369_v59 = vsub.s32 1, %v364_v40  ;;  %s400_s17 = sshll.u32 %s645_s4, 4  ;;  %s401_s17 = int_to_ptr.vmem [resolvable:$true] %s400_s17 }
  0x57   :  { %s608_s18 = scalar_lea.vmem %s401_s17, 256  ;;  %p613_p5 = scmp.lt.s32.totalorder %s401_s17, %s401_s17 }
  0x58   :  { %202 = vmatpush1.bf16.msra.mxu1 %v482_v15  ;;  %325 = vmatpush1.bf16.msra.mxu0 %v483_v16  ;;  %v366_v43 = vrot.slane %v361_v42, %v365_v41  ;;  %v370_v61 = vrot.slane %v361_v42, %v369_v59  ;;  %p609_p4 = scmp.ne.s32.totalorder %s401_s17, %s608_s18  ;;  %p614_p6 = scmp.lt.s32.totalorder %s608_s18, %s608_s18 }
  0x59   :  { %203 = vmatprep.subr.bf16.mxu1 %v484_v17  ;;  %326 = vmatprep.subr.bf16.mxu0 %v486_v18 }
  0x5a   :  { %p615_p7 = por %p614_p6, %p613_p5 }
  0x5c   :  { %204 = vmatpush1.bf16.msra.mxu1 %v488_v19  ;;  %327 = vmatpush1.bf16.msra.mxu0 %v489_v20  ;;  %p616_p8 = pnand %p615_p7, %p609_p4 }
  0x5d   :  { %205 = vmatprep.subr.bf16.mxu1 %v490_v21  ;;  %328 = vmatprep.subr.bf16.mxu0 %v492_v22 }
  0x60   :  { %206 = vmatpush1.bf16.msra.mxu1 %v494_v23  ;;  %329 = vmatpush1.bf16.msra.mxu0 %v495_v24 }
  0x61   :  { %207 = vmatprep.subr.bf16.mxu1 %v496_v25  ;;  %330 = vmatprep.subr.bf16.mxu0 %v498_v26 }
  0x64   :  { %208 = vmatpush1.bf16.msra.mxu1 %v500_v27  ;;  %331 = vmatpush1.bf16.msra.mxu0 %v501_v28 }
  0x65   :  { %209 = vmatprep.subr.bf16.mxu1 %v502_v29  ;;  %332 = vmatprep.subr.bf16.mxu0 %v504_v30 }
  0x68   :  { %210 = vmatpush1.bf16.msra.mxu1 %v506_v31  ;;  %333 = vmatpush1.bf16.msra.mxu0 %v507_v32 }
  0x6b   :  { %228 = vmatmul.mubr.bf16.vlgmr.msra.gmra.mrb[0].mxu1 %v82_v37  ;;  %351 = vmatmul.mubr.bf16.vlgmr.msra.gmra.mrb[0].mxu0 %v79_v38 }
 0x13e   :  { %v229_v44 = vpop.f32.mrb[0].mxu1  ;;  %v352_v45 = vpop.f32.mrb[0].mxu0 }
 0x13f   :  { %v353_v46 = vadd.f32 %v352_v45, %v229_v44  ;;  %v231_v47 = vpop.f32.mrb[1].mxu1  ;;  %v354_v48 = vpop.f32.mrb[1].mxu0 }
 0x140   :  { %v355_v49 = vadd.f32 %v354_v48, %v231_v47  ;;  %v233_v50 = vpop.f32.mrb[2].mxu1  ;;  %v356_v51 = vpop.f32.mrb[2].mxu0 }
 0x141   :  { %v373_v52 = vadd.f32 %v366_v43, %v353_v46  ;;  %v357_v53 = vadd.f32 %v356_v51, %v233_v50  ;;  %v235_v54 = vpop.f32.mrb[3].mxu1  ;;  %v358_v55 = vpop.f32.mrb[3].mxu0 }
 0x142   :  { %v359_v56 = vadd.f32 %v358_v55, %v235_v54  ;;  %v374_v62 = vadd.f32 %v370_v61, %v355_v49 }
 0x143   :  { %v446_v57 = vmul.f32 -1.442695, %v373_v52  ;;  %v375_v58 = vadd.f32 %v366_v43, %v357_v53 }
 0x144   :  { %v376_v0 = vadd.f32 %v370_v61, %v359_v56 }
 0x145   :  { %508 = vpow2.f32 %v446_v57  ;;  %v447_v60 = vmul.f32 -1.442695, %v375_v58 }
 0x147   :  { %510 = vpow2.f32 %v447_v60 }
 0x148   :  { %512 = vtanh.f32 %v374_v62 }
 0x14f   :  { %v509_v63 = vpop.eup %508 }
 0x150   :  { %v383_v1 = vadd.f32 1.0, %v509_v63 }
 0x151   :  { %v511_v2 = vpop.eup %510 }
 0x152   :  { %514 = vrcp.f32 %v383_v1  ;;  %v384_v3 = vadd.f32 1.0, %v511_v2  ;;  %v513_v4 = vpop.eup %512 }
 0x153   :  { %516 = vtanh.f32 %v376_v0 }
 0x154   :  { %518 = vrcp.f32 %v384_v3 }
 0x15c   :  { %v515_v5 = vpop.eup %514 }
 0x15d   :  { %v517_v6 = vpop.eup %516  ;;  %v391_v7 = vmul.f32 %v515_v5, %v513_v4 }
 0x15e   :  { %v519_v8 = vpop.eup %518 }
 0x15f   :  { %v392_v9 = vmul.f32 %v519_v8, %v517_v6  ;;  %393 = vst [vmem:[#allocation10] sm:$0xff] %v391_v7 }
 0x161   :  { %394 = vst [vmem:[#allocation10 + $0x8] sm:$0xff] %v392_v9 }
 0x162   :  { %619 = shalt.err (!%p616_p8)
}
 0x163   :  { %s620_s22 = scalar_lea.hbm %s773_s5, 256 }
 0x164   :  { %p621_p9 = scmp.ne.s32.totalorder %s773_s5, %s620_s22  ;;  %p624_p10 = scmp.lt.u32.totalorder %s620_s22, %s773_s5 }
 0x166   :  { %p626_p11 = pnand %p624_p10, %p621_p9 }
 0x168   :  { %629 = shalt.err (!%p626_p11)
}
 0x169   :  { %406 = dma.vmem_to_hbm [thread:$0]  %s401_s17, 256, %s773_s5, [#allocation4], %s640_s30, %s640_s30, %s641_s6  }
 0x16a   :  { %636 = dma.done.wait [#allocation4], 256  }
 0x16b   :  { %637 = vsyncadd [#allocation4], 4294967040 }
 0x16c   :  { %410 = vsyncpa [#allocation3], 1 }
 0x16d   :  { %411 = vsyncpa [#allocation6], 1 }
 0x16e   :  { %412 = vsyncpa [#allocation9], 1 }
 0x16f   :  { %413 = vsyncpa [#allocation4], 1 }

</bundles_post_ra>
